<compile_context>
chip_gen: v6e
topology: v6e:2x2x1
jax: 0.10.0
libtpu: 0.0.40
codegen_flags: <defaults>
</compile_context>

<pallas_src>
import jax
import jax.numpy as jnp
from jax.experimental import pallas as pl
from jax.experimental.pallas import tpu as pltpu

IN_F = 5            # input features  (module's "hidden_size")
HID = 32            # hidden width
NCLS = 5            # num_classes
FEAT_PAD = 8        # IN_F padded to the sublane granule
AUG = HID + 8       # 40: hidden width + constant-1 carrier row, padded to 8
ONES_ROW = IN_F     # row of the padded input that the kernel forces to 1.0
ONES_COL = HID      # index of the constant-1 carrier inside the augmented space

# Packed parameter buffer: one resident f32 array of shape (88, 40)
#   rows  0:40 , cols 0:8   -> W1aug (40, 8) :
#         rows 0:32  = [W1 (32,5) | b1 | 0 | 0], row 32 = e_5 (picks the ones row)
#   rows 40:80 , cols 0:40  -> W2aug (40, 40):
#         rows 0:32  = [W2 (32,32) | b2 | 0...], row 32 = e_32 (carries the 1)
#   rows 80:88 , cols 0:40  -> W3aug (8, 40) :
#         rows 0:5   = [W3 (5,32)  | b3 | 0...], rows 5:8 = 0
P_ROWS = 2 * AUG + FEAT_PAD   # 88
P_COLS = AUG                  # 40

TILE_B_DEFAULT = 32768        # lanes per grid step (multiple of 128); raiseable to 131072
SPLIT_MIN_DEFAULT = 8192      # below this, a single full-dim tile is cheaper than 2 steps


def ann_kernel(p_ref, x_ref, o_ref):
    # x tile is feature-major: (FEAT_PAD, tb) with batch on the lane axis.
    x = x_ref[...].astype(jnp.float32)
    row = jax.lax.broadcasted_iota(jnp.int32, x.shape, 0)
    # Force the bias-carrier row to 1.0 (rows 6,7 are multiplied by zero weights).
    xaug = jnp.where(row == ONES_ROW, 1.0, x)

    # Per-step unpack: three aligned rectangular slices of the resident buffer.
    w1 = p_ref[0:AUG, 0:FEAT_PAD]                    # (40, 8)
    w2 = p_ref[AUG:2 * AUG, 0:AUG]                   # (40, 40)
    w3 = p_ref[2 * AUG:2 * AUG + FEAT_PAD, 0:AUG]    # (8, 40)

    # Biases ride inside the matmuls (carrier row stays 1 through the ReLUs).
    h = jnp.maximum(jnp.dot(w1, xaug, preferred_element_type=jnp.float32), 0.0)  # (40, tb)
    h = jnp.maximum(jnp.dot(w2, h, preferred_element_type=jnp.float32), 0.0)     # (40, tb)
    y = jnp.dot(w3, h, preferred_element_type=jnp.float32)                       # (8, tb)

    o_ref[...] = y[0:NCLS, :].astype(o_ref.dtype)    # (5, tb), lane-dense


def pack_params(params):
    """Pack (w1,b1,w2,b2,w3,b3) [math layout w:(in,out), b:(1,out)] into the
    augmented (88, 40) f32 buffer described above.  Done once at init."""
    w1, b1, w2, b2, w3, b3 = params
    p = jnp.zeros((P_ROWS, P_COLS), jnp.float32)
    # layer 1 (augmented with bias column + ones-carrier row)
    p = p.at[0:HID, 0:IN_F].set(w1.T.astype(jnp.float32))
    p = p.at[0:HID, ONES_ROW].set(b1.reshape(-1).astype(jnp.float32))
    p = p.at[HID, ONES_ROW].set(1.0)
    # layer 2
    r0 = AUG
    p = p.at[r0:r0 + HID, 0:HID].set(w2.T.astype(jnp.float32))
    p = p.at[r0:r0 + HID, ONES_COL].set(b2.reshape(-1).astype(jnp.float32))
    p = p.at[r0 + HID, ONES_COL].set(1.0)
    # layer 3
    r0 = 2 * AUG
    p = p.at[r0:r0 + NCLS, 0:HID].set(w3.T.astype(jnp.float32))
    p = p.at[r0:r0 + NCLS, ONES_COL].set(b3.reshape(-1).astype(jnp.float32))
    return p


def _grid_plan(batch, tile_b, split_min):
    """Small batch: one full-dim tile (no padding, no extra step).
    Large batch: an even number of >=2 steps (both v7x TCs get equal work),
    tile rounded up to a lane multiple (128)."""
    if batch < split_min:
        return batch, 1
    steps = max(2, pl.cdiv(batch, tile_b))
    if steps % 2:
        steps += 1
    tile = ((batch + steps - 1) // steps + 127) // 128 * 128
    return tile, steps


def _vmem_limit_bytes(tb):
    io = 4 * FEAT_PAD * tb * 4       # double-buffered x + out tiles (out padded to 8 rows)
    interm = 3 * AUG * tb * 4        # spill headroom for the (40, tb) f32 activations
    params = P_ROWS * 128 * 4        # packed params, lane-padded
    est = int(1.5 * (io + interm + params)) + (2 << 20)
    return max(16 << 20, min(est, 64 << 20))   # 64 MiB cap = v7x physical VMEM


def ann_forward_fm(x_fm, packed, *, tile_b=TILE_B_DEFAULT, split_min=SPLIT_MIN_DEFAULT):
    """Optimized feature-major path.

    x_fm: (8, B) activations (rows 0:5 = features; rows 5:8 are ignored -- row 5
    is overwritten with the bias-carrier constant inside the kernel).
    Returns (5, B) feature-major logits in x_fm.dtype (f32 or bf16)."""
    assert x_fm.shape[0] == FEAT_PAD
    batch = x_fm.shape[1]
    tile_b = max(128, (int(tile_b) // 128) * 128)
    tb, steps = _grid_plan(batch, tile_b, split_min)
    b_pad = tb * steps
    if b_pad != batch:
        x_fm = jnp.pad(x_fm, ((0, 0), (0, b_pad - batch)))

    out = pl.pallas_call(
        ann_kernel,
        out_shape=jax.ShapeDtypeStruct((NCLS, b_pad), x_fm.dtype),
        grid=(steps,),
        in_specs=[
            # packed augmented params: resident across all batch tiles (one DMA)
            pl.BlockSpec((P_ROWS, P_COLS), lambda i: (0, 0)),
            # feature-major batch tile, streamed / software-pipelined along the grid
            pl.BlockSpec((FEAT_PAD, tb), lambda i: (0, i)),
        ],
        out_specs=pl.BlockSpec((NCLS, tb), lambda i: (0, i)),
        compiler_params=pltpu.CompilerParams(
            dimension_semantics=("parallel",),
            vmem_limit_bytes=_vmem_limit_bytes(tb),
        ),
    )(packed, x_fm)

    return out if b_pad == batch else out[:, :batch]


def ann_forward(x, packed, *, tile_b=TILE_B_DEFAULT, split_min=SPLIT_MIN_DEFAULT):
    """(B, 5) -> (B, 5) adapter matching the PyTorch module's interface.
    The transpose/pad here are host-side XLA ops kept ONLY for interface
    parity; for performance keep activations feature-major end-to-end and call
    ann_forward_fm directly."""
    x_fm = jnp.pad(jnp.transpose(x), ((0, FEAT_PAD - IN_F), (0, 0)))
    out_fm = ann_forward_fm(x_fm, packed, tile_b=tile_b, split_min=split_min)
    return jnp.transpose(out_fm)


def init_params(key, hidden_size=IN_F, num_classes=NCLS):
    """Deterministic init mimicking nn.Linear (uniform(-1/sqrt(fan_in), +))."""
    def linear(key, fan_in, fan_out):
        kw, kb = jax.random.split(key)
        bound = 1.0 / jnp.sqrt(fan_in)
        # Math layout (in, out); PyTorch's (out, in) is recovered in pack_params.
        w = jax.random.uniform(kw, (fan_in, fan_out), jnp.float32, -bound, bound)
        b = jax.random.uniform(kb, (1, fan_out), jnp.float32, -bound, bound)
        return w, b

    k1, k2, k3 = jax.random.split(key, 3)
    w1, b1 = linear(k1, hidden_size, 32)
    w2, b2 = linear(k2, 32, 32)
    w3, b3 = linear(k3, 32, num_classes)
    return (w1, b1, w2, b2, w3, b3)


def ann_reference(x, params):
    """Pure-JAX reference for correctness checks."""
    w1, b1, w2, b2, w3, b3 = params
    h1 = jnp.maximum(x @ w1 + b1, 0.0)
    h2 = jnp.maximum(h1 @ w2 + b2, 0.0)
    return h2 @ w3 + b3


if __name__ == "__main__":
    key = jax.random.PRNGKey(0)
    kp, k1, k2, k3, kg = jax.random.split(key, 5)
    params = init_params(kp)
    packed = pack_params(params)   # packed once, reused by every call

    # 1) Small batch through the (B, 5) compatibility adapter (single full-dim tile).
    x_small = jax.random.normal(k1, (8, IN_F), jnp.float32)
    out_small = jax.block_until_ready(ann_forward(x_small, packed))
    assert out_small.shape == (8, NCLS)
    assert jnp.allclose(out_small, ann_reference(x_small, params), atol=1e-3, rtol=1e-3)

    # 2) Multi-step even grid + batch padding (small tiles keep the test compile fast).
    x_med = jax.random.normal(k2, (1000, IN_F), jnp.float32)
    out_med = jax.block_until_ready(ann_forward(x_med, packed, tile_b=256, split_min=512))
    assert out_med.shape == (1000, NCLS)
    assert jnp.allclose(out_med, ann_reference(x_med, params), atol=1e-3, rtol=1e-3)

    # 3) Feature-major fast path (no host transposes); rows 5..7 of x_fm are ignored.
    B3 = 512
    x3 = jax.random.normal(k3, (B3, IN_F), jnp.float32)
    junk = jax.random.normal(kg, (FEAT_PAD - IN_F, B3), jnp.float32)
    x3_fm = jnp.concatenate([x3.T, junk], axis=0)             # (8, 512)
    out3_fm = jax.block_until_ready(ann_forward_fm(x3_fm, packed))
    assert out3_fm.shape == (NCLS, B3)
    assert jnp.allclose(out3_fm.T, ann_reference(x3, params), atol=1e-3, rtol=1e-3)

    # 4) bf16-streamed feature-major path (halves HBM bytes; f32 accumulation inside).
    x4_fm = x3_fm.astype(jnp.bfloat16)
    out4_fm = jax.block_until_ready(ann_forward_fm(x4_fm, packed))
    assert out4_fm.dtype == jnp.bfloat16
    ref4 = ann_reference(x4_fm[:IN_F, :].astype(jnp.float32).T, params)
    assert jnp.allclose(out4_fm.T.astype(jnp.float32), ref4, atol=5e-2, rtol=5e-2)

    print("KERNEL_OK")
</pallas_src>

<mosaic_0001>
module attributes {stable_mosaic.version = 11 : i64} {
  func.func @ann_kernel(%arg0: i32, %arg1: memref<88x40xf32, #tpu.memory_space<vmem>>, %arg2: memref<8x8xf32, #tpu.memory_space<vmem>>, %arg3: memref<5x8xf32, #tpu.memory_space<vmem>>) attributes {dimension_semantics = [#tpu.dimension_semantics<parallel>], iteration_bounds = array<i64: 1>, scalar_prefetch = 0 : i64, scratch_operands = 0 : i64, tpu.core_type = #tpu.core_type<tc>, window_params = [{pipeline_mode = #tpu.pipeline_mode<synchronous>, transform_indices = @transform_0, window_bounds = array<i64: 88, 40>}, {transform_indices = @transform_1, window_bounds = array<i64: 8, 8>}, {transform_indices = @transform_2, window_bounds = array<i64: 5, 8>}]} {
    %c0 = arith.constant 0 : index
    %c0_0 = arith.constant 0 : index
    %0 = vector.load %arg2[%c0, %c0_0] : memref<8x8xf32, #tpu.memory_space<vmem>>, vector<8x8xf32>
    %1 = tpu.iota {dimensions = array<i32: 0>} : vector<8x8xi32>
    %c5_i32 = arith.constant 5 : i32
    %2 = vector.broadcast %c5_i32 : i32 to vector<8x8xi32>
    %3 = arith.cmpi eq, %1, %2 : vector<8x8xi32>
    %cst = arith.constant 1.000000e+00 : f32
    %4 = vector.broadcast %cst : f32 to vector<8x8xf32>
    %5 = arith.select %3, %4, %0 : vector<8x8xi1>, vector<8x8xf32>
    %c0_1 = arith.constant 0 : index
    %c0_2 = arith.constant 0 : index
    %6 = vector.load %arg1[%c0_1, %c0_2] : memref<88x40xf32, #tpu.memory_space<vmem>>, vector<40x8xf32>
    %c40 = arith.constant 40 : index
    %c0_3 = arith.constant 0 : index
    %7 = vector.load %arg1[%c40, %c0_3] : memref<88x40xf32, #tpu.memory_space<vmem>>, vector<40x40xf32>
    %c80 = arith.constant 80 : index
    %c0_4 = arith.constant 0 : index
    %8 = vector.load %arg1[%c80, %c0_4] : memref<88x40xf32, #tpu.memory_space<vmem>>, vector<8x40xf32>
    %cst_5 = arith.constant dense<0.000000e+00> : vector<40x8xf32>
    %9 = tpu.matmul %6, %5, %cst_5 {dimension_numbers = #tpu.dot_dimension_numbers<[1], [0], [0], [1], [0, 0, 1, 1], [], []>} : vector<40x8xf32>, vector<8x8xf32>, vector<40x8xf32> -> vector<40x8xf32>
    %cst_6 = arith.constant 0.000000e+00 : f32
    %10 = vector.broadcast %cst_6 : f32 to vector<40x8xf32>
    %11 = arith.maximumf %9, %10 : vector<40x8xf32>
    %cst_7 = arith.constant dense<0.000000e+00> : vector<40x8xf32>
    %12 = tpu.matmul %7, %11, %cst_7 {dimension_numbers = #tpu.dot_dimension_numbers<[1], [0], [0], [1], [0, 0, 1, 1], [], []>} : vector<40x40xf32>, vector<40x8xf32>, vector<40x8xf32> -> vector<40x8xf32>
    %cst_8 = arith.constant 0.000000e+00 : f32
    %13 = vector.broadcast %cst_8 : f32 to vector<40x8xf32>
    %14 = arith.maximumf %12, %13 : vector<40x8xf32>
    %cst_9 = arith.constant dense<0.000000e+00> : vector<8x8xf32>
    %15 = tpu.matmul %8, %14, %cst_9 {dimension_numbers = #tpu.dot_dimension_numbers<[1], [0], [0], [1], [0, 0, 1, 1], [], []>} : vector<8x40xf32>, vector<40x8xf32>, vector<8x8xf32> -> vector<8x8xf32>
    %16 = vector.extract_strided_slice %15 {offsets = [0, 0], sizes = [5, 8], strides = [1, 1]} : vector<8x8xf32> to vector<5x8xf32>
    %c0_10 = arith.constant 0 : index
    %c0_11 = arith.constant 0 : index
    %17 = vector.load %arg3[%c0_10, %c0_11] : memref<5x8xf32, #tpu.memory_space<vmem>>, vector<5x8xf32>
    tpu.vector_store %arg3[%c0_10, %c0_11], %16 {strides = array<i32>} : memref<5x8xf32, #tpu.memory_space<vmem>>, vector<5x8xf32>,
    return
  }
  func.func @transform_0(%arg0: i32) -> (i32, i32) {
    %c0_i32 = arith.constant 0 : i32
    %c0_i32_0 = arith.constant 0 : i32
    %c0_i32_1 = arith.constant 0 : i32
    return %c0_i32, %c0_i32_0 : i32, i32
  }
  func.func @transform_1(%arg0: i32) -> (i32, i32) {
    %c0_i32 = arith.constant 0 : i32
    %c0_i32_0 = arith.constant 0 : i32
    return %c0_i32, %arg0 : i32, i32
  }
  func.func @transform_2(%arg0: i32) -> (i32, i32) {
    %c0_i32 = arith.constant 0 : i32
    %c0_i32_0 = arith.constant 0 : i32
    return %c0_i32, %arg0 : i32, i32
  }
}

</mosaic_0001>

<bundles_post_ra>
// kernel: tpu_custom_call.1
= control target key start
LH: loop header
LB: loop body
LE: loop exit
PB: predicated region body
PF: predicated region fallthrough
CT: control target
= control target key end

     0   :  { %v13_v0 = vlaneseq  ;;  %v452_v1 = vmov 0.0   ;;  %vm453_vm0 = vmmov 0   ;;  %s553_s0 = inlined_call_operand.vmem [shape: f32[88,40], index: 0, kind: input, shape index: {}]   ;;  %s554_s1 = inlined_call_operand.vmem [shape: f32[8,8], index: 1, kind: input, shape index: {}]   ;;  %s555_s2 = inlined_call_operand.hbm [shape: f32[5,8], index: 2, kind: output, shape index: {}]  }
   0x1   :  { %372 = vmatprep.subr.mxu0 %v452_v1  ;;  %374 = vmatprep.mubr.msk.f32.mxu0 %vm453_vm0, %v452_v1  ;;  %v12_v2 = vld [vmem:[%s554_s1] sm:$0xff] }
   0x2   :  { %v14_v3 = vshrl.u32 %v13_v0, 7  ;;  %389 = vmatprep.subr.mxu1 %v452_v1  ;;  %399 = vmatprep.mubr.msk.f32.mxu1 %vm453_vm0, %v452_v1 }
   0x3   :  { %7 = vsyncpa [#allocation3], 0  ;;  %v17_v4 = vld [vmem:[%s553_s0] sm:$0xff]  ;;  %vm28_vm2 = vcmask 64512   ;;  %v18_v6 = vld [vmem:[%s553_s0 + $0x8] sm:$0xff]  ;;  %vm139_vm3 = vcmask 326656  }
   0x4   :  { %vm15_vm1 = vcmp.eq.s32.totalorder %v14_v3, 5  ;;  %v19_v7 = vld [vmem:[%s553_s0 + $0x10] sm:$0xff]  ;;  %v20_v8 = vld [vmem:[%s553_s0 + $0x18] sm:$0xff]  ;;  %v21_v9 = vld [vmem:[%s553_s0 + $0x20] sm:$0xff]  ;;  %s454_s4 = smov [#allocation2]   ;;  %vm323_vm4 = vcmask 61440  }
   0x5   :  { %v16_v5 = vsel %vm15_vm1, 1.0, %v12_v2  ;;  %v22_v25 = vld [vmem:[%s553_s0 + $0x28] sm:$0xff]  ;;  %v23_v26 = vld [vmem:[%s553_s0 + $0x30] sm:$0xff]  ;;  %v24_v27 = vld [vmem:[%s553_s0 + $0x38] sm:$0xff]  ;;  %s331_s5 = sshll.u32 %s454_s4, 4  ;;  %s332_s5 = int_to_ptr.vmem [resolvable:$true] %s331_s5 }
   0x6   :  { %373 = vmatpush3.msra.mxu0 %v16_v5  ;;  %v25_v28 = vld [vmem:[%s553_s0 + $0x40] sm:$0xff]  ;;  %v26_v29 = vld [vmem:[%s553_s0 + $0x48] sm:$0xff]  ;;  %v27_v45 = vld [vmem:[%s553_s0 + $0x50] sm:$0xff]  ;;  %s430_s6 = scalar_lea.vmem %s332_s5, 128  ;;  %p435_p1 = scmp.lt.s32.totalorder %s332_s5, %s332_s5 }
   0x7   :  { %375 = vmatmul.mubr.msk.f32.vlgmr.msra.gmra.mxu0 %vm28_vm2, %v17_v4  ;;  %414 = vmatprep.subr.mxu0 %v452_v1  ;;  %p431_p0 = scmp.ne.s32.totalorder %s332_s5, %s430_s6  ;;  %p436_p2 = scmp.lt.s32.totalorder %s430_s6, %s430_s6 }
   0x8   :  { %377 = vmatprep.mubr.msk.f32.mxu0 %vm453_vm0, %v452_v1 }
   0x9   :  { %p437_p3 = por %p436_p2, %p435_p1 }
   0xb   :  { %378 = vmatmul.mubr.msk.f32.gmra.mxu0 %vm28_vm2, %v18_v6  ;;  %p438_p4 = pnand %p437_p3, %p431_p0 }
   0xc   :  { %380 = vmatprep.mubr.msk.f32.mxu0 %vm453_vm0, %v452_v1 }
   0xf   :  { %381 = vmatmul.mubr.msk.f32.gmra.mxu0 %vm28_vm2, %v19_v7 }
  0x10   :  { %383 = vmatprep.mubr.msk.f32.mxu0 %vm453_vm0, %v452_v1 }
  0x13   :  { %384 = vmatmul.mubr.msk.f32.gmra.mxu0 %vm28_vm2, %v20_v8 }
  0x14   :  { %386 = vmatprep.mubr.msk.f32.mxu0 %vm453_vm0, %v452_v1 }
  0x17   :  { %387 = vmatmul.mubr.msk.f32.gmra.mxu0 %vm28_vm2, %v21_v9 }
  0x18   :  { %424 = vmatprep.mubr.msk.f32.mxu0 %vm453_vm0, %v452_v1 }
  0xc7   :  { %v110_v10 = vpop.f32.mrf.mxu0 }
  0xc8   :  { %v134_v24 = vmax.f32 %v110_v10, 0.0 }
  0xc9   :  { %v376_v11 = vpop.f32.mrf.mxu0 }
  0xcb   :  { %v115_v12 = vpop.f32.mrf.mxu0 }
  0xcc   :  { %v135_v23 = vmax.f32 %v115_v12, 0.0 }
  0xcd   :  { %v379_v13 = vpop.f32.mrf.mxu0 }
  0xcf   :  { %v120_v14 = vpop.f32.mrf.mxu0 }
  0xd0   :  { %v136_v22 = vmax.f32 %v120_v14, 0.0 }
  0xd1   :  { %v382_v15 = vpop.f32.mrf.mxu0 }
  0xd3   :  { %v125_v16 = vpop.f32.mrf.mxu0 }
  0xd4   :  { %v137_v21 = vmax.f32 %v125_v16, 0.0 }
  0xd5   :  { %v385_v17 = vpop.f32.mrf.mxu0 }
  0xd7   :  { %v130_v18 = vpop.f32.mrf.mxu0 }
  0xd8   :  { %v138_v19 = vmax.f32 %v130_v18, 0.0 }
  0xd9   :  { %v388_v20 = vpop.f32.mrf.mxu0 }
  0xda   :  { %390 = vmatpush3.msra.mxu1 %v138_v19 }
  0xdb   :  { %391 = vmatprep.subr.mxu1 %v452_v1 }
  0xdc   :  { %392 = vmatpush3.msra.mxu1 %v137_v21 }
  0xdd   :  { %393 = vmatprep.subr.mxu1 %v452_v1 }
  0xde   :  { %394 = vmatpush3.msra.mxu1 %v136_v22 }
  0xdf   :  { %395 = vmatprep.subr.mxu1 %v452_v1 }
  0xe0   :  { %396 = vmatpush3.msra.mxu1 %v135_v23 }
  0xe1   :  { %397 = vmatprep.subr.mxu1 %v452_v1 }
  0xe2   :  { %398 = vmatpush3.msra.mxu1 %v134_v24 }
  0xe3   :  { %400 = vmatmul.mubr.msk.f32.vlgmr.msra.gmra.mxu1 %vm139_vm3, %v22_v25 }
  0xe4   :  { %402 = vmatprep.mubr.msk.f32.mxu1 %vm453_vm0, %v452_v1 }
  0xe7   :  { %403 = vmatmul.mubr.msk.f32.gmra.mxu1 %vm139_vm3, %v23_v26 }
  0xe8   :  { %405 = vmatprep.mubr.msk.f32.mxu1 %vm453_vm0, %v452_v1 }
  0xeb   :  { %406 = vmatmul.mubr.msk.f32.gmra.mxu1 %vm139_vm3, %v24_v27 }
  0xec   :  { %408 = vmatprep.mubr.msk.f32.mxu1 %vm453_vm0, %v452_v1 }
  0xef   :  { %409 = vmatmul.mubr.msk.f32.gmra.mxu1 %vm139_vm3, %v25_v28 }
  0xf0   :  { %411 = vmatprep.mubr.msk.f32.mxu1 %vm453_vm0, %v452_v1 }
  0xf3   :  { %412 = vmatmul.mubr.msk.f32.gmra.mxu1 %vm139_vm3, %v26_v29 }
 0x1a3   :  { %v221_v30 = vpop.f32.mrf.mxu1 }
 0x1a4   :  { %v245_v44 = vmax.f32 %v221_v30, 0.0 }
 0x1a5   :  { %v401_v31 = vpop.f32.mrf.mxu1 }
 0x1a7   :  { %v226_v32 = vpop.f32.mrf.mxu1 }
 0x1a8   :  { %v246_v43 = vmax.f32 %v226_v32, 0.0 }
 0x1a9   :  { %v404_v33 = vpop.f32.mrf.mxu1 }
 0x1ab   :  { %v231_v34 = vpop.f32.mrf.mxu1 }
 0x1ac   :  { %v247_v42 = vmax.f32 %v231_v34, 0.0 }
 0x1ad   :  { %v407_v35 = vpop.f32.mrf.mxu1 }
 0x1af   :  { %v236_v36 = vpop.f32.mrf.mxu1 }
 0x1b0   :  { %v248_v41 = vmax.f32 %v236_v36, 0.0 }
 0x1b1   :  { %v410_v37 = vpop.f32.mrf.mxu1 }
 0x1b3   :  { %v241_v38 = vpop.f32.mrf.mxu1 }
 0x1b4   :  { %v249_v39 = vmax.f32 %v241_v38, 0.0 }
 0x1b5   :  { %v413_v40 = vpop.f32.mrf.mxu1 }
 0x1b6   :  { %415 = vmatpush3.msra.mxu0 %v249_v39 }
 0x1b7   :  { %416 = vmatprep.subr.mxu0 %v452_v1 }
 0x1b8   :  { %417 = vmatpush3.msra.mxu0 %v248_v41 }
 0x1b9   :  { %418 = vmatprep.subr.mxu0 %v452_v1 }
 0x1ba   :  { %419 = vmatpush3.msra.mxu0 %v247_v42 }
 0x1bb   :  { %420 = vmatprep.subr.mxu0 %v452_v1 }
 0x1bc   :  { %421 = vmatpush3.msra.mxu0 %v246_v43 }
 0x1bd   :  { %422 = vmatprep.subr.mxu0 %v452_v1 }
 0x1be   :  { %423 = vmatpush3.msra.mxu0 %v245_v44 }
 0x1bf   :  { %425 = vmatmul.mubr.msk.f32.vlgmr.msra.gmra.mxu0 %vm139_vm3, %v27_v45 }
 0x27f   :  { %v319_v46 = vpop.f32.mrf.mxu0 }
 0x280   :  { %324 = vst.msk [vmem:[#allocation2] sm:$0x1f] %vm323_vm4, %v319_v46 }
 0x281   :  { %v426_v47 = vpop.f32.mrf.mxu0 }
 0x282   :  { %441 = shalt.err (!%p438_p4)
}
 0x283   :  { %334 = dma.vmem_to_hbm [thread:$0]  %s332_s5, 128, %s555_s2, [#allocation3]  }
 0x284   :  { %450 = dma.done.wait [#allocation3], 128  }
 0x285   :  { %451 = vsyncadd [#allocation3], 4294967168 }
 0x286   :  { %338 = vsyncpa [#allocation3], 1 }

</bundles_post_ra>
